<compile_context>
chip_gen: v7x
topology: tpu7x:2x2x1
jax: 0.10.0
libtpu: 0.0.40
codegen_flags: <defaults>
</compile_context>

<pallas_src>
import functools

import jax
import jax.numpy as jnp
from jax.experimental import pallas as pl
from jax.experimental.pallas import tpu as pltpu


# ------------------------------- fused kernel -------------------------------

def _tcn_stage_kernel(x_ref, m_ref, w_in_ref, b_in_ref,
                      wd_ref, bd_ref, wp_ref, bp_ref,
                      w_out_ref, b_out_ref, o_ref,
                      *, seq_len, dilations, compute_dtype):
    """One (Bb*T, .) slab per grid step; all layers fused, h resident in VMEM.

    Ref shapes (batch folded into rows, M = Bb * seq_len):
      x_ref:     (M, in_dim)      m_ref:     (M, 1)      o_ref: (M, out_pad)
      w_in_ref:  (in_dim, H)      b_in_ref:  (1, H)
      wd_ref:    (L, 3, H, H)     bd_ref:    (L, 1, H)
      wp_ref:    (L, H, H)        bp_ref:    (L, 1, H)
      w_out_ref: (H, out_pad)     b_out_ref: (1, out_pad)
    """
    M = x_ref.shape[0]
    H = w_in_ref.shape[1]
    Bb = M // seq_len
    cdt = compute_dtype

    def mm(a, w):
        # MXU matmul with f32 accumulation; weights are already pre-cast to
        # `cdt` in the wrapper, only the activation is cast here.
        return jnp.dot(a.astype(cdt), w, preferred_element_type=jnp.float32)

    # Hoisted loop invariants (JAX does not CSE broadcast_in_dim).
    mask = m_ref[...]                                         # (M, 1) f32
    mask_h = jnp.broadcast_to(mask, (M, H))                   # (M, H) f32
    # Per-row time index within its batch slab (for the causal roll masks).
    t_idx = jax.lax.broadcasted_iota(
        jnp.int32, (Bb, seq_len, H), 1).reshape(M, H)

    def causal_shift(h, s):
        # out[r] = h[r - s] within each batch slab, zeros for the first s rows
        # of each slab.  Rolling the flat array wraps rows across slab
        # boundaries, but those are exactly the rows the time mask zeroes.
        rolled = pltpu.roll(h, shift=s, axis=0)               # XLU sublane roll
        return jnp.where(t_idx >= s, rolled, 0.0)             # VPU select

    # conv_1x1 input projection: (M, in_dim) @ (in_dim, H)
    h = mm(x_ref[...], w_in_ref[...]) + b_in_ref[...]         # (M, H) f32

    for l, d in enumerate(dilations):                         # static unroll
        # Causal dilated conv (K=3, left pad 2d): three accumulated
        # (M, H) @ (H, H) matmuls (H is lane-sparse, so no (M, 3H) lane concat).
        # TODO(synk): when H % 128 == 0, switch to one stacked (M,3H)@(3H,H)
        # matmul for deeper K on the MXU.
        z = mm(h, wd_ref[l, 2]) + bd_ref[l]                   # tap k=2: t
        for k, s in ((1, d), (0, 2 * d)):                     # taps t-d, t-2d
            if s < seq_len:                                   # else: all-pad, +0
                z = z + mm(causal_shift(h, s), wd_ref[l, k])
        z = jnp.maximum(z, 0.0)                               # ReLU
        z = mm(z, wp_ref[l]) + bp_ref[l]                      # conv_1x1
        # TODO(synk): nn.Dropout() inside the layer is train-mode stochastic;
        # implemented here as the eval-mode identity.
        h = (h + z) * mask_h                                  # residual + mask

    # TODO(synk): the p=0.2 dropout before conv_out is also eval-mode identity.
    out = mm(h, w_out_ref[...]) + b_out_ref[...]              # conv_out
    o_ref[...] = (out * mask).astype(o_ref.dtype)             # lane-dense store


# ------------------------------ model wrapper --------------------------------

def single_stage_tcn(params, x, m=None, dilate=True,
                     compute_dtype=jnp.bfloat16, block_batch=None):
    """x: (B, T, in_dim); m: (B, T, 1) or None.  Returns (B, T, out_dim)."""
    B, T, in_dim = x.shape
    if m is None:
        m = jnp.ones((B, T, 1), x.dtype)
    layers = params['layers']
    L = len(layers)
    H = params['w_in'].shape[1]
    out_dim = params['w_out'].shape[1]
    dilations = tuple(2 ** i if dilate else 1 for i in range(L))

    if block_batch is None:
        block_batch = B          # fold all batches into the matmul M dimension
    assert B % block_batch == 0, "block_batch must divide B"
    assert T % 8 == 0, "T must be a multiple of 8 (sublane tiling)"
    Mb = block_batch * T
    grid = (B // block_batch,)

    cdt = compute_dtype
    # Lane-dense output: zero-pad out_dim up to a multiple of 128 (padded
    # weight/bias lanes are zero; padded lanes are sliced off after the call).
    out_p = -(-out_dim // 128) * 128
    w_out = jnp.pad(params['w_out'], ((0, 0), (0, out_p - out_dim)))
    b_out = jnp.pad(params['b_out'], ((0, 0), (0, out_p - out_dim)))

    # Cast weights to the MXU dtype once; biases stay f32 (added post-matmul).
    w_in = params['w_in'].astype(cdt)
    w_out = w_out.astype(cdt)
    wd_all = jnp.stack([lp['wd'] for lp in layers]).astype(cdt)   # (L,3,H,H)
    wp_all = jnp.stack([lp['wp'] for lp in layers]).astype(cdt)   # (L,H,H)
    bd_all = jnp.stack([lp['bd'] for lp in layers])               # (L,1,H)
    bp_all = jnp.stack([lp['bp'] for lp in layers])               # (L,1,H)

    # Fold batch into rows outside the kernel (cheap XLA reshapes on HBM).
    x2 = x.reshape(B * T, in_dim)
    m2 = m.reshape(B * T, 1).astype(jnp.float32)

    kernel = functools.partial(_tcn_stage_kernel, seq_len=T,
                               dilations=dilations, compute_dtype=cdt)

    # TODO(synk): at production sizes (large T/H/L), additionally tile T with a
    # 2*sum(dilations) causal halo, bound weight VMEM via a layer grid axis (or
    # pl.Buffered(1) weight specs), and set vmem_limit_bytes explicitly; at the
    # shapes here everything fits comfortably in the default scoped VMEM.
    out = pl.pallas_call(
        kernel,
        out_shape=jax.ShapeDtypeStruct((B * T, out_p), x.dtype),
        grid=grid,
        in_specs=[
            pl.BlockSpec((Mb, in_dim), lambda i: (i, 0)),        # x
            pl.BlockSpec((Mb, 1), lambda i: (i, 0)),             # m
            pl.BlockSpec((in_dim, H), lambda i: (0, 0)),         # w_in
            pl.BlockSpec((1, H), lambda i: (0, 0)),              # b_in
            pl.BlockSpec((L, 3, H, H), lambda i: (0, 0, 0, 0)),  # wd_all
            pl.BlockSpec((L, 1, H), lambda i: (0, 0, 0)),        # bd_all
            pl.BlockSpec((L, H, H), lambda i: (0, 0, 0)),        # wp_all
            pl.BlockSpec((L, 1, H), lambda i: (0, 0, 0)),        # bp_all
            pl.BlockSpec((H, out_p), lambda i: (0, 0)),          # w_out
            pl.BlockSpec((1, out_p), lambda i: (0, 0)),          # b_out
        ],
        out_specs=pl.BlockSpec((Mb, out_p), lambda i: (i, 0)),
        compiler_params=pltpu.CompilerParams(
            dimension_semantics=("parallel",)),
    )(x2, m2, w_in, params['b_in'], wd_all, bd_all, wp_all, bp_all,
      w_out, b_out)

    return out.reshape(B, T, out_p)[..., :out_dim]


# ------------------------------ params / reference ---------------------------

def _init(key, shape, fan_in):
    bound = 1.0 / float(fan_in) ** 0.5
    return jax.random.uniform(key, shape, jnp.float32, -bound, bound)


def init_params(key, in_dim, hidden_dim, out_dim, num_layers):
    keys = iter(jax.random.split(key, 4 + 4 * num_layers))
    params = {
        'w_in': _init(next(keys), (in_dim, hidden_dim), in_dim),
        'b_in': _init(next(keys), (1, hidden_dim), in_dim),
        'layers': [],
    }
    for _ in range(num_layers):
        params['layers'].append({
            'wd': _init(next(keys), (3, hidden_dim, hidden_dim), 3 * hidden_dim),
            'bd': _init(next(keys), (1, hidden_dim), 3 * hidden_dim),
            'wp': _init(next(keys), (hidden_dim, hidden_dim), hidden_dim),
            'bp': _init(next(keys), (1, hidden_dim), hidden_dim),
        })
    params['w_out'] = _init(next(keys), (hidden_dim, out_dim), hidden_dim)
    params['b_out'] = _init(next(keys), (1, out_dim), hidden_dim)
    return params


def reference(params, x, m, dilate=True):
    B, T, _ = x.shape
    h = jnp.einsum('bti,ih->bth', x, params['w_in']) + params['b_in']
    for i, lp in enumerate(params['layers']):
        d = 2 ** i if dilate else 1
        xp = jnp.pad(h, ((0, 0), (2 * d, 0), (0, 0)))
        s = sum(jnp.einsum('bth,hd->btd', xp[:, k * d:k * d + T, :], lp['wd'][k])
                for k in range(3)) + lp['bd']
        o = jnp.maximum(s, 0.0)
        o = jnp.einsum('bth,hd->btd', o, lp['wp']) + lp['bp']
        h = (h + o) * m
    return (jnp.einsum('bth,ho->bto', h, params['w_out'])
            + params['b_out']) * m


# ----------------------------------- main ------------------------------------

if __name__ == "__main__":
    B, T, IN_DIM, HIDDEN, OUT_DIM, NUM_LAYERS = 2, 16, 8, 32, 8, 3

    key = jax.random.PRNGKey(0)
    kx, km, kp = jax.random.split(key, 3)
    x = jax.random.normal(kx, (B, T, IN_DIM), jnp.float32)
    m = (jax.random.uniform(km, (B, T, 1)) > 0.2).astype(jnp.float32)
    params = init_params(kp, IN_DIM, HIDDEN, OUT_DIM, NUM_LAYERS)

    y_ref = reference(params, x, m, dilate=True)

    # f32-MXU path: tight check against the pure-JAX reference.
    y = jax.block_until_ready(
        single_stage_tcn(params, x, m, dilate=True, compute_dtype=jnp.float32))
    assert y.shape == (B, T, OUT_DIM)
    assert jnp.allclose(y, y_ref, atol=1e-4, rtol=1e-4)

    # Default bf16-MXU path (f32 residual stream / f32 accumulation): looser.
    y_bf16 = jax.block_until_ready(single_stage_tcn(params, x, m, dilate=True))
    assert jnp.allclose(y_bf16, y_ref, atol=1e-1, rtol=1e-1)

    print("KERNEL_OK")
</pallas_src>

<mosaic_0001>
module attributes {stable_mosaic.version = 11 : i64} {
  func.func @_tcn_stage_kernel(%arg0: i32, %arg1: memref<32x8xf32, #tpu.memory_space<vmem>>, %arg2: memref<32x1xf32, #tpu.memory_space<vmem>>, %arg3: memref<8x32xf32, #tpu.memory_space<vmem>>, %arg4: memref<1x32xf32, #tpu.memory_space<vmem>>, %arg5: memref<3x3x32x32xf32, #tpu.memory_space<vmem>>, %arg6: memref<3x1x32xf32, #tpu.memory_space<vmem>>, %arg7: memref<3x32x32xf32, #tpu.memory_space<vmem>>, %arg8: memref<3x1x32xf32, #tpu.memory_space<vmem>>, %arg9: memref<32x128xf32, #tpu.memory_space<vmem>>, %arg10: memref<1x128xf32, #tpu.memory_space<vmem>>, %arg11: memref<32x128xf32, #tpu.memory_space<vmem>>) attributes {dimension_semantics = [#tpu.dimension_semantics<parallel>], iteration_bounds = array<i64: 1>, scalar_prefetch = 0 : i64, scratch_operands = 0 : i64, tpu.core_type = #tpu.core_type<tc>, window_params = [{transform_indices = @transform_0, window_bounds = array<i64: 32, 8>}, {transform_indices = @transform_1, window_bounds = array<i64: 32, 1>}, {pipeline_mode = #tpu.pipeline_mode<synchronous>, transform_indices = @transform_2, window_bounds = array<i64: 8, 32>}, {pipeline_mode = #tpu.pipeline_mode<synchronous>, transform_indices = @transform_3, window_bounds = array<i64: 1, 32>}, {pipeline_mode = #tpu.pipeline_mode<synchronous>, transform_indices = @transform_4, window_bounds = array<i64: 3, 3, 32, 32>}, {pipeline_mode = #tpu.pipeline_mode<synchronous>, transform_indices = @transform_5, window_bounds = array<i64: 3, 1, 32>}, {pipeline_mode = #tpu.pipeline_mode<synchronous>, transform_indices = @transform_6, window_bounds = array<i64: 3, 32, 32>}, {pipeline_mode = #tpu.pipeline_mode<synchronous>, transform_indices = @transform_7, window_bounds = array<i64: 3, 1, 32>}, {pipeline_mode = #tpu.pipeline_mode<synchronous>, transform_indices = @transform_8, window_bounds = array<i64: 32, 128>}, {pipeline_mode = #tpu.pipeline_mode<synchronous>, transform_indices = @transform_9, window_bounds = array<i64: 1, 128>}, {transform_indices = @transform_10, window_bounds = array<i64: 32, 128>}]} {
    %c0 = arith.constant 0 : index
    %c0_0 = arith.constant 0 : index
    %0 = vector.load %arg2[%c0, %c0_0] : memref<32x1xf32, #tpu.memory_space<vmem>>, vector<32x1xf32>
    %1 = vector.shape_cast %0 : vector<32x1xf32> to vector<32x1xf32>
    %2 = vector.broadcast %1 : vector<32x1xf32> to vector<32x32xf32>
    %3 = tpu.iota {dimensions = array<i32: 1>} : vector<2x16x32xi32>
    %4 = vector.shape_cast %3 : vector<2x16x32xi32> to vector<32x32xi32>
    %c0_1 = arith.constant 0 : index
    %c0_2 = arith.constant 0 : index
    %5 = vector.load %arg1[%c0_1, %c0_2] : memref<32x8xf32, #tpu.memory_space<vmem>>, vector<32x8xf32>
    %c0_3 = arith.constant 0 : index
    %c0_4 = arith.constant 0 : index
    %6 = vector.load %arg3[%c0_3, %c0_4] : memref<8x32xf32, #tpu.memory_space<vmem>>, vector<8x32xf32>
    %cst = arith.constant dense<0.000000e+00> : vector<32x32xf32>
    %7 = tpu.matmul %5, %6, %cst {dimension_numbers = #tpu.dot_dimension_numbers<[1], [0], [0], [1], [0, 0, 1, 1], [], []>} : vector<32x8xf32>, vector<8x32xf32>, vector<32x32xf32> -> vector<32x32xf32>
    %c0_5 = arith.constant 0 : index
    %c0_6 = arith.constant 0 : index
    %8 = vector.load %arg4[%c0_5, %c0_6] : memref<1x32xf32, #tpu.memory_space<vmem>>, vector<1x32xf32>
    %9 = vector.broadcast %8 : vector<1x32xf32> to vector<32x32xf32>
    %10 = arith.addf %7, %9 : vector<32x32xf32>
    %c0_7 = arith.constant 0 : index
    %c2 = arith.constant 2 : index
    %c0_8 = arith.constant 0 : index
    %c0_9 = arith.constant 0 : index
    %11 = vector.load %arg5[%c0_7, %c2, %c0_8, %c0_9] : memref<3x3x32x32xf32, #tpu.memory_space<vmem>>, vector<1x1x32x32xf32>
    %12 = vector.shape_cast %11 : vector<1x1x32x32xf32> to vector<32x32xf32>
    %cst_10 = arith.constant dense<0.000000e+00> : vector<32x32xf32>
    %13 = tpu.matmul %10, %12, %cst_10 {dimension_numbers = #tpu.dot_dimension_numbers<[1], [0], [0], [1], [0, 0, 1, 1], [], []>} : vector<32x32xf32>, vector<32x32xf32>, vector<32x32xf32> -> vector<32x32xf32>
    %c0_11 = arith.constant 0 : index
    %c0_12 = arith.constant 0 : index
    %c0_13 = arith.constant 0 : index
    %14 = vector.load %arg6[%c0_11, %c0_12, %c0_13] : memref<3x1x32xf32, #tpu.memory_space<vmem>>, vector<1x1x32xf32>
    %15 = vector.shape_cast %14 : vector<1x1x32xf32> to vector<1x32xf32>
    %16 = vector.broadcast %15 : vector<1x32xf32> to vector<32x32xf32>
    %17 = arith.addf %13, %16 : vector<32x32xf32>
    %c1_i32 = arith.constant 1 : i32
    %18 = tpu.dynamic_rotate %10 by %c1_i32 dim 0 : vector<32x32xf32>, i32 -> vector<32x32xf32>
    %c1_i32_14 = arith.constant 1 : i32
    %19 = vector.broadcast %c1_i32_14 : i32 to vector<32x32xi32>
    %20 = arith.cmpi sge, %4, %19 : vector<32x32xi32>
    %cst_15 = arith.constant 0.000000e+00 : f32
    %21 = vector.broadcast %cst_15 : f32 to vector<32x32xf32>
    %22 = arith.select %20, %18, %21 : vector<32x32xi1>, vector<32x32xf32>
    %c0_16 = arith.constant 0 : index
    %c1 = arith.constant 1 : index
    %c0_17 = arith.constant 0 : index
    %c0_18 = arith.constant 0 : index
    %23 = vector.load %arg5[%c0_16, %c1, %c0_17, %c0_18] : memref<3x3x32x32xf32, #tpu.memory_space<vmem>>, vector<1x1x32x32xf32>
    %24 = vector.shape_cast %23 : vector<1x1x32x32xf32> to vector<32x32xf32>
    %cst_19 = arith.constant dense<0.000000e+00> : vector<32x32xf32>
    %25 = tpu.matmul %22, %24, %cst_19 {dimension_numbers = #tpu.dot_dimension_numbers<[1], [0], [0], [1], [0, 0, 1, 1], [], []>} : vector<32x32xf32>, vector<32x32xf32>, vector<32x32xf32> -> vector<32x32xf32>
    %26 = arith.addf %17, %25 : vector<32x32xf32>
    %c2_i32 = arith.constant 2 : i32
    %27 = tpu.dynamic_rotate %10 by %c2_i32 dim 0 : vector<32x32xf32>, i32 -> vector<32x32xf32>
    %c2_i32_20 = arith.constant 2 : i32
    %28 = vector.broadcast %c2_i32_20 : i32 to vector<32x32xi32>
    %29 = arith.cmpi sge, %4, %28 : vector<32x32xi32>
    %cst_21 = arith.constant 0.000000e+00 : f32
    %30 = vector.broadcast %cst_21 : f32 to vector<32x32xf32>
    %31 = arith.select %29, %27, %30 : vector<32x32xi1>, vector<32x32xf32>
    %c0_22 = arith.constant 0 : index
    %c0_23 = arith.constant 0 : index
    %c0_24 = arith.constant 0 : index
    %c0_25 = arith.constant 0 : index
    %32 = vector.load %arg5[%c0_22, %c0_23, %c0_24, %c0_25] : memref<3x3x32x32xf32, #tpu.memory_space<vmem>>, vector<1x1x32x32xf32>
    %33 = vector.shape_cast %32 : vector<1x1x32x32xf32> to vector<32x32xf32>
    %cst_26 = arith.constant dense<0.000000e+00> : vector<32x32xf32>
    %34 = tpu.matmul %31, %33, %cst_26 {dimension_numbers = #tpu.dot_dimension_numbers<[1], [0], [0], [1], [0, 0, 1, 1], [], []>} : vector<32x32xf32>, vector<32x32xf32>, vector<32x32xf32> -> vector<32x32xf32>
    %35 = arith.addf %26, %34 : vector<32x32xf32>
    %cst_27 = arith.constant 0.000000e+00 : f32
    %36 = vector.broadcast %cst_27 : f32 to vector<32x32xf32>
    %37 = arith.maximumf %35, %36 : vector<32x32xf32>
    %c0_28 = arith.constant 0 : index
    %c0_29 = arith.constant 0 : index
    %c0_30 = arith.constant 0 : index
    %38 = vector.load %arg7[%c0_28, %c0_29, %c0_30] : memref<3x32x32xf32, #tpu.memory_space<vmem>>, vector<1x32x32xf32>
    %39 = vector.shape_cast %38 : vector<1x32x32xf32> to vector<32x32xf32>
    %cst_31 = arith.constant dense<0.000000e+00> : vector<32x32xf32>
    %40 = tpu.matmul %37, %39, %cst_31 {dimension_numbers = #tpu.dot_dimension_numbers<[1], [0], [0], [1], [0, 0, 1, 1], [], []>} : vector<32x32xf32>, vector<32x32xf32>, vector<32x32xf32> -> vector<32x32xf32>
    %c0_32 = arith.constant 0 : index
    %c0_33 = arith.constant 0 : index
    %c0_34 = arith.constant 0 : index
    %41 = vector.load %arg8[%c0_32, %c0_33, %c0_34] : memref<3x1x32xf32, #tpu.memory_space<vmem>>, vector<1x1x32xf32>
    %42 = vector.shape_cast %41 : vector<1x1x32xf32> to vector<1x32xf32>
    %43 = vector.broadcast %42 : vector<1x32xf32> to vector<32x32xf32>
    %44 = arith.addf %40, %43 : vector<32x32xf32>
    %45 = arith.addf %10, %44 : vector<32x32xf32>
    %46 = arith.mulf %45, %2 : vector<32x32xf32>
    %c1_35 = arith.constant 1 : index
    %c2_36 = arith.constant 2 : index
    %c0_37 = arith.constant 0 : index
    %c0_38 = arith.constant 0 : index
    %47 = vector.load %arg5[%c1_35, %c2_36, %c0_37, %c0_38] : memref<3x3x32x32xf32, #tpu.memory_space<vmem>>, vector<1x1x32x32xf32>
    %48 = vector.shape_cast %47 : vector<1x1x32x32xf32> to vector<32x32xf32>
    %cst_39 = arith.constant dense<0.000000e+00> : vector<32x32xf32>
    %49 = tpu.matmul %46, %48, %cst_39 {dimension_numbers = #tpu.dot_dimension_numbers<[1], [0], [0], [1], [0, 0, 1, 1], [], []>} : vector<32x32xf32>, vector<32x32xf32>, vector<32x32xf32> -> vector<32x32xf32>
    %c1_40 = arith.constant 1 : index
    %c0_41 = arith.constant 0 : index
    %c0_42 = arith.constant 0 : index
    %50 = vector.load %arg6[%c1_40, %c0_41, %c0_42] : memref<3x1x32xf32, #tpu.memory_space<vmem>>, vector<1x1x32xf32>
    %51 = vector.shape_cast %50 : vector<1x1x32xf32> to vector<1x32xf32>
    %52 = vector.broadcast %51 : vector<1x32xf32> to vector<32x32xf32>
    %53 = arith.addf %49, %52 : vector<32x32xf32>
    %c2_i32_43 = arith.constant 2 : i32
    %54 = tpu.dynamic_rotate %46 by %c2_i32_43 dim 0 : vector<32x32xf32>, i32 -> vector<32x32xf32>
    %c2_i32_44 = arith.constant 2 : i32
    %55 = vector.broadcast %c2_i32_44 : i32 to vector<32x32xi32>
    %56 = arith.cmpi sge, %4, %55 : vector<32x32xi32>
    %cst_45 = arith.constant 0.000000e+00 : f32
    %57 = vector.broadcast %cst_45 : f32 to vector<32x32xf32>
    %58 = arith.select %56, %54, %57 : vector<32x32xi1>, vector<32x32xf32>
    %c1_46 = arith.constant 1 : index
    %c1_47 = arith.constant 1 : index
    %c0_48 = arith.constant 0 : index
    %c0_49 = arith.constant 0 : index
    %59 = vector.load %arg5[%c1_46, %c1_47, %c0_48, %c0_49] : memref<3x3x32x32xf32, #tpu.memory_space<vmem>>, vector<1x1x32x32xf32>
    %60 = vector.shape_cast %59 : vector<1x1x32x32xf32> to vector<32x32xf32>
    %cst_50 = arith.constant dense<0.000000e+00> : vector<32x32xf32>
    %61 = tpu.matmul %58, %60, %cst_50 {dimension_numbers = #tpu.dot_dimension_numbers<[1], [0], [0], [1], [0, 0, 1, 1], [], []>} : vector<32x32xf32>, vector<32x32xf32>, vector<32x32xf32> -> vector<32x32xf32>
    %62 = arith.addf %53, %61 : vector<32x32xf32>
    %c4_i32 = arith.constant 4 : i32
    %63 = tpu.dynamic_rotate %46 by %c4_i32 dim 0 : vector<32x32xf32>, i32 -> vector<32x32xf32>
    %c4_i32_51 = arith.constant 4 : i32
    %64 = vector.broadcast %c4_i32_51 : i32 to vector<32x32xi32>
    %65 = arith.cmpi sge, %4, %64 : vector<32x32xi32>
    %cst_52 = arith.constant 0.000000e+00 : f32
    %66 = vector.broadcast %cst_52 : f32 to vector<32x32xf32>
    %67 = arith.select %65, %63, %66 : vector<32x32xi1>, vector<32x32xf32>
    %c1_53 = arith.constant 1 : index
    %c0_54 = arith.constant 0 : index
    %c0_55 = arith.constant 0 : index
    %c0_56 = arith.constant 0 : index
    %68 = vector.load %arg5[%c1_53, %c0_54, %c0_55, %c0_56] : memref<3x3x32x32xf32, #tpu.memory_space<vmem>>, vector<1x1x32x32xf32>
    %69 = vector.shape_cast %68 : vector<1x1x32x32xf32> to vector<32x32xf32>
    %cst_57 = arith.constant dense<0.000000e+00> : vector<32x32xf32>
    %70 = tpu.matmul %67, %69, %cst_57 {dimension_numbers = #tpu.dot_dimension_numbers<[1], [0], [0], [1], [0, 0, 1, 1], [], []>} : vector<32x32xf32>, vector<32x32xf32>, vector<32x32xf32> -> vector<32x32xf32>
    %71 = arith.addf %62, %70 : vector<32x32xf32>
    %cst_58 = arith.constant 0.000000e+00 : f32
    %72 = vector.broadcast %cst_58 : f32 to vector<32x32xf32>
    %73 = arith.maximumf %71, %72 : vector<32x32xf32>
    %c1_59 = arith.constant 1 : index
    %c0_60 = arith.constant 0 : index
    %c0_61 = arith.constant 0 : index
    %74 = vector.load %arg7[%c1_59, %c0_60, %c0_61] : memref<3x32x32xf32, #tpu.memory_space<vmem>>, vector<1x32x32xf32>
    %75 = vector.shape_cast %74 : vector<1x32x32xf32> to vector<32x32xf32>
    %cst_62 = arith.constant dense<0.000000e+00> : vector<32x32xf32>
    %76 = tpu.matmul %73, %75, %cst_62 {dimension_numbers = #tpu.dot_dimension_numbers<[1], [0], [0], [1], [0, 0, 1, 1], [], []>} : vector<32x32xf32>, vector<32x32xf32>, vector<32x32xf32> -> vector<32x32xf32>
    %c1_63 = arith.constant 1 : index
    %c0_64 = arith.constant 0 : index
    %c0_65 = arith.constant 0 : index
    %77 = vector.load %arg8[%c1_63, %c0_64, %c0_65] : memref<3x1x32xf32, #tpu.memory_space<vmem>>, vector<1x1x32xf32>
    %78 = vector.shape_cast %77 : vector<1x1x32xf32> to vector<1x32xf32>
    %79 = vector.broadcast %78 : vector<1x32xf32> to vector<32x32xf32>
    %80 = arith.addf %76, %79 : vector<32x32xf32>
    %81 = arith.addf %46, %80 : vector<32x32xf32>
    %82 = arith.mulf %81, %2 : vector<32x32xf32>
    %c2_66 = arith.constant 2 : index
    %c2_67 = arith.constant 2 : index
    %c0_68 = arith.constant 0 : index
    %c0_69 = arith.constant 0 : index
    %83 = vector.load %arg5[%c2_66, %c2_67, %c0_68, %c0_69] : memref<3x3x32x32xf32, #tpu.memory_space<vmem>>, vector<1x1x32x32xf32>
    %84 = vector.shape_cast %83 : vector<1x1x32x32xf32> to vector<32x32xf32>
    %cst_70 = arith.constant dense<0.000000e+00> : vector<32x32xf32>
    %85 = tpu.matmul %82, %84, %cst_70 {dimension_numbers = #tpu.dot_dimension_numbers<[1], [0], [0], [1], [0, 0, 1, 1], [], []>} : vector<32x32xf32>, vector<32x32xf32>, vector<32x32xf32> -> vector<32x32xf32>
    %c2_71 = arith.constant 2 : index
    %c0_72 = arith.constant 0 : index
    %c0_73 = arith.constant 0 : index
    %86 = vector.load %arg6[%c2_71, %c0_72, %c0_73] : memref<3x1x32xf32, #tpu.memory_space<vmem>>, vector<1x1x32xf32>
    %87 = vector.shape_cast %86 : vector<1x1x32xf32> to vector<1x32xf32>
    %88 = vector.broadcast %87 : vector<1x32xf32> to vector<32x32xf32>
    %89 = arith.addf %85, %88 : vector<32x32xf32>
    %c4_i32_74 = arith.constant 4 : i32
    %90 = tpu.dynamic_rotate %82 by %c4_i32_74 dim 0 : vector<32x32xf32>, i32 -> vector<32x32xf32>
    %c4_i32_75 = arith.constant 4 : i32
    %91 = vector.broadcast %c4_i32_75 : i32 to vector<32x32xi32>
    %92 = arith.cmpi sge, %4, %91 : vector<32x32xi32>
    %cst_76 = arith.constant 0.000000e+00 : f32
    %93 = vector.broadcast %cst_76 : f32 to vector<32x32xf32>
    %94 = arith.select %92, %90, %93 : vector<32x32xi1>, vector<32x32xf32>
    %c2_77 = arith.constant 2 : index
    %c1_78 = arith.constant 1 : index
    %c0_79 = arith.constant 0 : index
    %c0_80 = arith.constant 0 : index
    %95 = vector.load %arg5[%c2_77, %c1_78, %c0_79, %c0_80] : memref<3x3x32x32xf32, #tpu.memory_space<vmem>>, vector<1x1x32x32xf32>
    %96 = vector.shape_cast %95 : vector<1x1x32x32xf32> to vector<32x32xf32>
    %cst_81 = arith.constant dense<0.000000e+00> : vector<32x32xf32>
    %97 = tpu.matmul %94, %96, %cst_81 {dimension_numbers = #tpu.dot_dimension_numbers<[1], [0], [0], [1], [0, 0, 1, 1], [], []>} : vector<32x32xf32>, vector<32x32xf32>, vector<32x32xf32> -> vector<32x32xf32>
    %98 = arith.addf %89, %97 : vector<32x32xf32>
    %c8_i32 = arith.constant 8 : i32
    %99 = tpu.dynamic_rotate %82 by %c8_i32 dim 0 : vector<32x32xf32>, i32 -> vector<32x32xf32>
    %c8_i32_82 = arith.constant 8 : i32
    %100 = vector.broadcast %c8_i32_82 : i32 to vector<32x32xi32>
    %101 = arith.cmpi sge, %4, %100 : vector<32x32xi32>
    %cst_83 = arith.constant 0.000000e+00 : f32
    %102 = vector.broadcast %cst_83 : f32 to vector<32x32xf32>
    %103 = arith.select %101, %99, %102 : vector<32x32xi1>, vector<32x32xf32>
    %c2_84 = arith.constant 2 : index
    %c0_85 = arith.constant 0 : index
    %c0_86 = arith.constant 0 : index
    %c0_87 = arith.constant 0 : index
    %104 = vector.load %arg5[%c2_84, %c0_85, %c0_86, %c0_87] : memref<3x3x32x32xf32, #tpu.memory_space<vmem>>, vector<1x1x32x32xf32>
    %105 = vector.shape_cast %104 : vector<1x1x32x32xf32> to vector<32x32xf32>
    %cst_88 = arith.constant dense<0.000000e+00> : vector<32x32xf32>
    %106 = tpu.matmul %103, %105, %cst_88 {dimension_numbers = #tpu.dot_dimension_numbers<[1], [0], [0], [1], [0, 0, 1, 1], [], []>} : vector<32x32xf32>, vector<32x32xf32>, vector<32x32xf32> -> vector<32x32xf32>
    %107 = arith.addf %98, %106 : vector<32x32xf32>
    %cst_89 = arith.constant 0.000000e+00 : f32
    %108 = vector.broadcast %cst_89 : f32 to vector<32x32xf32>
    %109 = arith.maximumf %107, %108 : vector<32x32xf32>
    %c2_90 = arith.constant 2 : index
    %c0_91 = arith.constant 0 : index
    %c0_92 = arith.constant 0 : index
    %110 = vector.load %arg7[%c2_90, %c0_91, %c0_92] : memref<3x32x32xf32, #tpu.memory_space<vmem>>, vector<1x32x32xf32>
    %111 = vector.shape_cast %110 : vector<1x32x32xf32> to vector<32x32xf32>
    %cst_93 = arith.constant dense<0.000000e+00> : vector<32x32xf32>
    %112 = tpu.matmul %109, %111, %cst_93 {dimension_numbers = #tpu.dot_dimension_numbers<[1], [0], [0], [1], [0, 0, 1, 1], [], []>} : vector<32x32xf32>, vector<32x32xf32>, vector<32x32xf32> -> vector<32x32xf32>
    %c2_94 = arith.constant 2 : index
    %c0_95 = arith.constant 0 : index
    %c0_96 = arith.constant 0 : index
    %113 = vector.load %arg8[%c2_94, %c0_95, %c0_96] : memref<3x1x32xf32, #tpu.memory_space<vmem>>, vector<1x1x32xf32>
    %114 = vector.shape_cast %113 : vector<1x1x32xf32> to vector<1x32xf32>
    %115 = vector.broadcast %114 : vector<1x32xf32> to vector<32x32xf32>
    %116 = arith.addf %112, %115 : vector<32x32xf32>
    %117 = arith.addf %82, %116 : vector<32x32xf32>
    %118 = arith.mulf %117, %2 : vector<32x32xf32>
    %c0_97 = arith.constant 0 : index
    %c0_98 = arith.constant 0 : index
    %119 = vector.load %arg9[%c0_97, %c0_98] : memref<32x128xf32, #tpu.memory_space<vmem>>, vector<32x128xf32>
    %cst_99 = arith.constant dense<0.000000e+00> : vector<32x128xf32>
    %120 = tpu.matmul %118, %119, %cst_99 {dimension_numbers = #tpu.dot_dimension_numbers<[1], [0], [0], [1], [0, 0, 1, 1], [], []>} : vector<32x32xf32>, vector<32x128xf32>, vector<32x128xf32> -> vector<32x128xf32>
    %c0_100 = arith.constant 0 : index
    %c0_101 = arith.constant 0 : index
    %121 = vector.load %arg10[%c0_100, %c0_101] : memref<1x128xf32, #tpu.memory_space<vmem>>, vector<1x128xf32>
    %122 = vector.broadcast %121 : vector<1x128xf32> to vector<32x128xf32>
    %123 = arith.addf %120, %122 : vector<32x128xf32>
    %124 = vector.broadcast %0 : vector<32x1xf32> to vector<32x128xf32>
    %125 = arith.mulf %123, %124 : vector<32x128xf32>
    %c0_102 = arith.constant 0 : index
    %c0_103 = arith.constant 0 : index
    %126 = vector.load %arg11[%c0_102, %c0_103] : memref<32x128xf32, #tpu.memory_space<vmem>>, vector<32x128xf32>
    tpu.vector_store %arg11[%c0_102, %c0_103], %125 {strides = array<i32>} : memref<32x128xf32, #tpu.memory_space<vmem>>, vector<32x128xf32>,
    return
  }
  func.func @transform_0(%arg0: i32) -> (i32, i32) {
    %c0_i32 = arith.constant 0 : i32
    %c0_i32_0 = arith.constant 0 : i32
    return %arg0, %c0_i32 : i32, i32
  }
  func.func @transform_1(%arg0: i32) -> (i32, i32) {
    %c0_i32 = arith.constant 0 : i32
    %c0_i32_0 = arith.constant 0 : i32
    return %arg0, %c0_i32 : i32, i32
  }
  func.func @transform_2(%arg0: i32) -> (i32, i32) {
    %c0_i32 = arith.constant 0 : i32
    %c0_i32_0 = arith.constant 0 : i32
    %c0_i32_1 = arith.constant 0 : i32
    return %c0_i32, %c0_i32_0 : i32, i32
  }
  func.func @transform_3(%arg0: i32) -> (i32, i32) {
    %c0_i32 = arith.constant 0 : i32
    %c0_i32_0 = arith.constant 0 : i32
    %c0_i32_1 = arith.constant 0 : i32
    return %c0_i32, %c0_i32_0 : i32, i32
  }
  func.func @transform_4(%arg0: i32) -> (i32, i32, i32, i32) {
    %c0_i32 = arith.constant 0 : i32
    %c0_i32_0 = arith.constant 0 : i32
    %c0_i32_1 = arith.constant 0 : i32
    %c0_i32_2 = arith.constant 0 : i32
    %c0_i32_3 = arith.constant 0 : i32
    return %c0_i32, %c0_i32_0, %c0_i32_1, %c0_i32_2 : i32, i32, i32, i32
  }
  func.func @transform_5(%arg0: i32) -> (i32, i32, i32) {
    %c0_i32 = arith.constant 0 : i32
    %c0_i32_0 = arith.constant 0 : i32
    %c0_i32_1 = arith.constant 0 : i32
    %c0_i32_2 = arith.constant 0 : i32
    return %c0_i32, %c0_i32_0, %c0_i32_1 : i32, i32, i32
  }
  func.func @transform_6(%arg0: i32) -> (i32, i32, i32) {
    %c0_i32 = arith.constant 0 : i32
    %c0_i32_0 = arith.constant 0 : i32
    %c0_i32_1 = arith.constant 0 : i32
    %c0_i32_2 = arith.constant 0 : i32
    return %c0_i32, %c0_i32_0, %c0_i32_1 : i32, i32, i32
  }
  func.func @transform_7(%arg0: i32) -> (i32, i32, i32) {
    %c0_i32 = arith.constant 0 : i32
    %c0_i32_0 = arith.constant 0 : i32
    %c0_i32_1 = arith.constant 0 : i32
    %c0_i32_2 = arith.constant 0 : i32
    return %c0_i32, %c0_i32_0, %c0_i32_1 : i32, i32, i32
  }
  func.func @transform_8(%arg0: i32) -> (i32, i32) {
    %c0_i32 = arith.constant 0 : i32
    %c0_i32_0 = arith.constant 0 : i32
    %c0_i32_1 = arith.constant 0 : i32
    return %c0_i32, %c0_i32_0 : i32, i32
  }
  func.func @transform_9(%arg0: i32) -> (i32, i32) {
    %c0_i32 = arith.constant 0 : i32
    %c0_i32_0 = arith.constant 0 : i32
    %c0_i32_1 = arith.constant 0 : i32
    return %c0_i32, %c0_i32_0 : i32, i32
  }
  func.func @transform_10(%arg0: i32) -> (i32, i32) {
    %c0_i32 = arith.constant 0 : i32
    %c0_i32_0 = arith.constant 0 : i32
    return %arg0, %c0_i32 : i32, i32
  }
}

</mosaic_0001>

<bundles_post_ra>
// kernel: tpu_custom_call.1
= control target key start
LH: loop header
LB: loop body
LE: loop exit
PB: predicated region body
PF: predicated region fallthrough
CT: control target
= control target key end

     0   :  { %15 = vsyncpa [#allocation3], 0  ;;  %s2711_s0 = inlined_call_operand.vmem [shape: f32[32,8], index: 0, kind: input, shape index: {}]   ;;  %s2712_s1 = inlined_call_operand.vmem [shape: f32[32,1], index: 1, kind: input, shape index: {}]   ;;  %s2713_s2 = inlined_call_operand.vmem [shape: f32[8,32], index: 2, kind: input, shape index: {}]   ;;  %s2714_s3 = inlined_call_operand.vmem [shape: f32[1,32], index: 3, kind: input, shape index: {}]   ;;  %s2715_s4 = inlined_call_operand.hbm [shape: f32[3,3,32,32], index: 4, kind: input, shape index: {}]   ;;  %s2716_s5 = inlined_call_operand.vmem [shape: f32[3,1,32], index: 5, kind: input, shape index: {}]   ;;  %s2717_s6 = inlined_call_operand.hbm [shape: f32[3,32,32], index: 6, kind: input, shape index: {}]   ;;  %s2718_s7 = inlined_call_operand.vmem [shape: f32[3,1,32], index: 7, kind: input, shape index: {}]   ;;  %s2719_s8 = inlined_call_operand.vmem [shape: f32[32,128], index: 8, kind: input, shape index: {}]   ;;  %s2720_s9 = inlined_call_operand.vmem [shape: f32[1,128], index: 9, kind: input, shape index: {}]   ;;  %s2721_s10 = inlined_call_operand.hbm [shape: f32[32,128], index: 10, kind: output, shape index: {}]  }
   0x1   :  { %16 = vsyncpa [#allocation6], 0 }
   0x2   :  { %17 = vsyncpa [#allocation4], 0  ;;  %s2325_s13 = smov [#allocation2]   ;;  %s2253_s17 = scalar_lea.hbm %s2715_s4, 4608 }
   0x3   :  { %s31_s14 = sshll.u32 %s2325_s13, 4  ;;  %p2254_p0 = scmp.ne.s32.totalorder %s2715_s4, %s2253_s17  ;;  %s32_s14 = int_to_ptr.vmem [resolvable:$true] %s31_s14 }
   0x4   :  { %p2257_p1 = scmp.lt.u32.totalorder %s2253_s17, %s2715_s4 }
   0x6   :  { %p2259_p2 = pnand %p2257_p1, %p2254_p0 }
   0x8   :  { %2262 = shalt.err (!%p2259_p2)
}
   0x9   :  { %s2263_s22 = scalar_lea.vmem %s32_s14, 4608  ;;  %p2268_p4 = scmp.lt.s32.totalorder %s32_s14, %s32_s14 }
   0xa   :  { %p2264_p3 = scmp.ne.s32.totalorder %s32_s14, %s2263_s22  ;;  %p2269_p5 = scmp.lt.s32.totalorder %s2263_s22, %s2263_s22 }
   0xc   :  { %p2270_p6 = por %p2269_p5, %p2268_p4 }
   0xe   :  { %p2271_p7 = pnand %p2270_p6, %p2264_p3 }
  0x10   :  { %2274 = shalt.err (!%p2271_p7)
}
  0x11   :  { %s2326_s23 = smov 128   ;;  %s2327_s24 = smov 8  }
  0x12   :  { %37 = dma.hbm_to_vmem [thread:$0]  %s2715_s4, 4608, %s32_s14, [#allocation3], %s2326_s23, %s2326_s23, %s2327_s24  }
  0x13   :  { %s2328_s27 = smov [#allocation5]   ;;  %s2275_s11 = scalar_lea.hbm %s2717_s6, 1536 }
  0x14   :  { %s45_s28 = sshll.u32 %s2328_s27, 4  ;;  %p2276_p8 = scmp.ne.s32.totalorder %s2717_s6, %s2275_s11  ;;  %s46_s28 = int_to_ptr.vmem [resolvable:$true] %s45_s28 }
  0x15   :  { %p2279_p9 = scmp.lt.u32.totalorder %s2275_s11, %s2717_s6 }
  0x17   :  { %p2281_p10 = pnand %p2279_p9, %p2276_p8 }
  0x19   :  { %2284 = shalt.err (!%p2281_p10)
}
  0x1a   :  { %s2285_s17 = scalar_lea.vmem %s46_s28, 1536  ;;  %p2290_p12 = scmp.lt.s32.totalorder %s46_s28, %s46_s28 }
  0x1b   :  { %p2286_p11 = scmp.ne.s32.totalorder %s46_s28, %s2285_s17  ;;  %p2291_p13 = scmp.lt.s32.totalorder %s2285_s17, %s2285_s17 }
  0x1d   :  { %p2292_p0 = por %p2291_p13, %p2290_p12 }
  0x1f   :  { %p2293_p1 = pnand %p2292_p0, %p2286_p11 }
  0x21   :  { %2296 = shalt.err (!%p2293_p1)
}
  0x22   :  { %51 = dma.hbm_to_vmem [thread:$0]  %s2717_s6, 1536, %s46_s28, [#allocation6], %s2326_s23, %s2326_s23, %s2327_s24  }
  0x23   :  { %2319 = dma.done.wait [#allocation3], 4608  }
  0x24   :  { %2320 = vsyncadd [#allocation3], 4294962688 }
  0x25   :  { %2321 = dma.done.wait [#allocation6], 1536  }
  0x26   :  { %2322 = vsyncadd [#allocation6], 4294965760  ;;  %vm103_vm0 = vcmask 64512   ;;  %v95_v0 = vld [vmem:[%s2713_s2] sm:$0xff]  ;;  %v92_v2 = vld [vmem:[%s2711_s0 + $0x8] sm:$0xff]  ;;  %v88_v21 = vlaneseq  ;;  %vm213_vm1 = vcmask 261120  }
  0x27   :  { %v91_v1 = vld [vmem:[%s2711_s0] sm:$0xff]  ;;  %1914 = vmatprep.subr.mxu0 %v95_v0  ;;  %v93_v3 = vld [vmem:[%s2711_s0 + $0x10] sm:$0xff]  ;;  %v203_v5 = vld [vmem:[#allocation2 + $0x48] sm:$0xff]  ;;  %v2329_v62 = vmov 0   ;;  %s2331_s11 = smov [#allocation7]  }
  0x28   :  { %1916 = vmatprep.mubr.msk.f32.mxu0 %vm103_vm0, %v91_v1  ;;  %v202_v4 = vld [vmem:[#allocation2 + $0x40] sm:$0xff]  ;;  %1915 = vmatpush3.msra.mxu0 %v95_v0  ;;  %v94_v7 = vld [vmem:[%s2711_s0 + $0x18] sm:$0xff]  ;;  %v204_v8 = vld [vmem:[#allocation2 + $0x50] sm:$0xff]  ;;  %v2445_v27 = vshrl.u32 %v88_v21, 7  ;;  %s1726_s12 = sshll.u32 %s2331_s11, 4  ;;  %s1727_s12 = int_to_ptr.vmem [resolvable:$true] %s1726_s12 }
  0x29   :  { %1917 = vmatmul.mubr.msk.f32.vlgmr.msra.gmra.mrb[0].mxu0 %vm103_vm0, %v92_v2  ;;  %v2104_v6 = vpack.c.bf16 %v203_v5, %v202_v4  ;;  %v205_v9 = vld [vmem:[#allocation2 + $0x58] sm:$0xff]  ;;  %v327_v11 = vld [vmem:[#allocation2 + $0x20] sm:$0xff]  ;;  %v328_v12 = vld [vmem:[#allocation2 + $0x28] sm:$0xff]  ;;  %2251 = vset.pattern.permute.xlu0 %v2329_v62  ;;  %p2302_p3 = scmp.lt.s32.totalorder %s1727_s12, %s1727_s12 }
  0x2a   :  { %1919 = vmatprep.mubr.msk.f32.mxu0 %vm103_vm0, %v93_v3  ;;  %v2108_v10 = vpack.c.bf16 %v205_v9, %v204_v8  ;;  %v2112_v13 = vpack.c.bf16 %v328_v12, %v327_v11  ;;  %v556_v14 = vld [vmem:[#allocation5] sm:$0xff]  ;;  %v557_v15 = vld [vmem:[#allocation5 + $0x8] sm:$0xff]  ;;  %v329_v19 = vld [vmem:[#allocation2 + $0x30] sm:$0xff]  ;;  %vm320_vm2 = vcmp.ge.s32.totalorder %v2445_v27, 1  ;;  %vm315_vm3 = vcmp.lt.s32.totalorder %v2445_v27, 1  ;;  %2252 = vset.pattern.permute.xlu1 %v2329_v62 }
  0x2b   :  { %2105 = vmatprep.subr.bf16.mxu1 %v2104_v6  ;;  %v2128_v16 = vpack.c.bf16 %v557_v15, %v556_v14  ;;  %v1739_v17 = vld [vmem:[%s2714_s3] ss:$0 sm:$0xff]  ;;  %v330_v20 = vld [vmem:[#allocation2 + $0x38] sm:$0xff]  ;;  %v448_v29 = vld [vmem:[#allocation2 + $0x8] sm:$0xff]  ;;  %vm436_vm4 = vcmp.lt.s32.totalorder %v2445_v27, 2  ;;  %vm441_vm5 = vcmp.ge.s32.totalorder %v2445_v27, 2 }
  0x2c   :  { %2107 = vmatpush3.bf16.msra.mxu1 %v2104_v6  ;;  %v2116_v25 = vpack.c.bf16 %v330_v20, %v329_v19  ;;  %v447_v28 = vld [vmem:[#allocation2] sm:$0xff]  ;;  %v449_v38 = vld [vmem:[#allocation2 + $0x10] sm:$0xff]  ;;  %v450_v39 = vld [vmem:[#allocation2 + $0x18] sm:$0xff]  ;;  %vm904_vm6 = vcmp.lt.s32.totalorder %v2445_v27, 4  ;;  %vm909_vm7 = vcmp.ge.s32.totalorder %v2445_v27, 4 }
  0x2d   :  { %1920 = vmatmul.mubr.msk.f32.gmra.mrb[2].mxu0 %vm103_vm0, %v94_v7  ;;  %2109 = vmatprep.subr.bf16.mxu1 %v2108_v10  ;;  %v2120_v35 = vpack.c.bf16 %v448_v29, %v447_v28  ;;  %v2124_v44 = vpack.c.bf16 %v450_v39, %v449_v38  ;;  %v558_v57 = vld [vmem:[#allocation5 + $0x10] sm:$0xff]  ;;  %v559_v58 = vld [vmem:[#allocation5 + $0x18] sm:$0xff]  ;;  %v64_v60 = vld [vmem:[%s2712_s1] sm:$0xff] }
  0x2e   :  { %2129 = vmatprep.subr.bf16.mxu0 %v2128_v16  ;;  %v2132_v59 = vpack.c.bf16 %v559_v58, %v558_v57  ;;  %v66_v61 = vld [vmem:[%s2712_s1 + $0x10] sm:$0xff]  ;;  %70 = vperm.xlu0 %2251, %v64_v60   ;;  %v65_v63 = vld [vmem:[%s2712_s1 + $0x8] sm:$0xff]  ;;  %v67_v0 = vld [vmem:[%s2712_s1 + $0x18] sm:$0xff] }
  0x2f   :  { %2131 = vmatpush3.bf16.msra.mxu0 %v2128_v16  ;;  %80 = vperm.xlu1 %2252, %v66_v61   ;;  %v1744_v1 = vld [vmem:[%s2716_s5] ss:$0 sm:$0xff]  ;;  %v674_v15 = vld [vmem:[#allocation2 + $0xa8] sm:$0xff]  ;;  %v918_v58 = vld [vmem:[#allocation2 + $0x70] sm:$0xff] }
  0x30   :  { %2111 = vmatpush3.bf16.msra.mxu1 %v2108_v10  ;;  %2133 = vmatprep.subr.bf16.mxu0 %v2132_v59  ;;  %v673_v14 = vld [vmem:[#allocation2 + $0xa0] sm:$0xff]  ;;  %v796_v21 = vld [vmem:[#allocation2 + $0x88] sm:$0xff] }
  0x31   :  { %2113 = vmatprep.subr.bf16.mxu1 %v2112_v13  ;;  %v2136_v16 = vpack.c.bf16 %v674_v15, %v673_v14  ;;  %v795_v20 = vld [vmem:[#allocation2 + $0x80] sm:$0xff]  ;;  %v1029_v14 = vld [vmem:[#allocation5 + $0x38] sm:$0xff] }
  0x32   :  { %75 = vperm.xlu0 %2251, %v65_v63   ;;  %v1757_v29 = vld [vmem:[%s2718_s7] ss:$0 sm:$0xff]  ;;  %v1783_v27 = vld [vmem:[%s2716_s5 + $0x2] ss:$0 sm:$0xff] }
  0x33   :  { %2135 = vmatpush3.bf16.msra.mxu0 %v2132_v59  ;;  %85 = vperm.xlu1 %2252, %v67_v0   ;;  %v919_v59 = vld [vmem:[#allocation2 + $0x78] sm:$0xff] }
  0x34   :  { %2137 = vmatprep.subr.bf16.mxu0 %v2136_v16  ;;  %v2156_v0 = vpack.c.bf16 %v919_v59, %v918_v58  ;;  %v1268_v58 = vld [vmem:[#allocation2 + $0xf0] sm:$0xff]  ;;  %v1269_v59 = vld [vmem:[#allocation2 + $0xf8] sm:$0xff] }
  0xfc   :  { %v1918_v18 = vpop.f32.mrb[0].mxu0 }
  0xfd   :  { %v182_v22 = vpop.f32.mrb[1].mxu0  ;;  %v2441_v24 = vadd.f32 %v1918_v18, %v1739_v17  ;;  %v676_v18 = vld [vmem:[#allocation2 + $0xb8] sm:$0xff] }
  0xfe   :  { %v2439_v23 = vadd.f32 %v1739_v17, %v182_v22  ;;  %v2144_v22 = vpack.c.bf16 %v796_v21, %v795_v20 }
  0xff   :  { %v312_v36 = vrot.slane %v2441_v24, 7  ;;  %v433_v50 = vrot.slane %v2441_v24, 6 }
 0x100   :  { %v1921_v26 = vpop.f32.mrb[2].mxu0  ;;  %1930 = vmatprep.mubr.msk.f32.mxu1 %vm213_vm1, %v2439_v23  ;;  %v311_v33 = vrot.slane %v2439_v23, 7  ;;  %v432_v45 = vrot.slane %v2439_v23, 6 }
 0x101   :  { %v2447_v30 = vadd.f32 %v1921_v26, %v1739_v17  ;;  %v192_v31 = vpop.f32.mrb[3].mxu0  ;;  %1931 = vmatmul.mubr.msk.f32.vlgmr.msra.gmra.mrb[0].mxu1 %vm213_vm1, %v2441_v24  ;;  %v1027_v26 = vld [vmem:[#allocation5 + $0x28] sm:$0xff] }
 0x102   :  { %v2451_v32 = vadd.f32 %v1739_v17, %v192_v31  ;;  %2115 = vmatpush3.bf16.msra.mxu1 %v2112_v13  ;;  %v318_v46 = vsel %vm315_vm3, %v311_v33, %v312_v36  ;;  %v439_v54 = vsel %vm436_vm4, %v432_v45, %v433_v50  ;;  %v675_v17 = vld [vmem:[#allocation2 + $0xb0] sm:$0xff]  ;;  %v2523_v31 = vpop.permute.xlu0 %70 }
 0x103   :  { %v314_v34 = vrot.slane %v2447_v30, 7  ;;  %2117 = vmatprep.subr.bf16.mxu1 %v2116_v25  ;;  %v435_v41 = vrot.slane %v2447_v30, 6  ;;  %v2140_v19 = vpack.c.bf16 %v676_v18, %v675_v17 }
 0x104   :  { %v313_v37 = vrot.slane %v2451_v32, 7  ;;  %1933 = vmatprep.mubr.msk.f32.mxu1 %vm213_vm1, %v2451_v32  ;;  %v434_v48 = vrot.slane %v2451_v32, 6 }
 0x105   :  { %1934 = vmatmul.mubr.msk.f32.gmra.mrb[2].mxu1 %vm213_vm1, %v2447_v30  ;;  %v319_v40 = vsel %vm315_vm3, %v314_v34, %v311_v33  ;;  %v440_v49 = vsel %vm436_vm4, %v435_v41, %v432_v45 }
 0x106   :  { %2119 = vmatpush3.bf16.msra.mxu1 %v2116_v25  ;;  %v322_v42 = vsel %vm320_vm2, %v319_v40, 0.0  ;;  %v317_v43 = vsel %vm315_vm3, %v312_v36, %v313_v37  ;;  %v316_v51 = vsel %vm315_vm3, %v313_v37, %v314_v34  ;;  %v443_v52 = vsel %vm441_vm5, %v440_v49, 0.0  ;;  %v1026_v25 = vld [vmem:[#allocation5 + $0x20] sm:$0xff]  ;;  %v2525_v37 = vpop.permute.xlu1 %80 }
 0x107   :  { %1944 = vmatprep.mubr.msk.f32.mxu1 %vm213_vm1, %v322_v42  ;;  %2121 = vmatprep.subr.bf16.mxu1 %v2120_v35  ;;  %v324_v47 = vsel %vm320_vm2, %v317_v43, 0.0  ;;  %v438_v53 = vsel %vm436_vm4, %v433_v50, %v434_v48  ;;  %v437_v56 = vsel %vm436_vm4, %v434_v48, %v435_v41  ;;  %v2160_v28 = vpack.c.bf16 %v1027_v26, %v1026_v25  ;;  %v797_v41 = vld [vmem:[#allocation2 + $0x90] sm:$0xff]  ;;  %v798_v42 = vld [vmem:[#allocation2 + $0x98] sm:$0xff] }
 0x108   :  { %v445_v55 = vsel %vm441_vm5, %v438_v53, 0.0  ;;  %v2148_v50 = vpack.c.bf16 %v798_v42, %v797_v41  ;;  %v1266_v42 = vld [vmem:[#allocation2 + $0xe0] sm:$0xff] }
 0x109   :  { %1945 = vmatmul.mubr.msk.f32.vlgmr.msra.gmra.mrb[0].mxu1 %vm213_vm1, %v318_v46  ;;  %v2532_v46 = vpop.permute.xlu0 %75 }
 0x10a   :  { %2123 = vmatpush3.bf16.msra.mxu1 %v2120_v35  ;;  %1947 = vmatprep.mubr.msk.f32.mxu1 %vm213_vm1, %v324_v47 }
 0x10b   :  { %2125 = vmatprep.subr.bf16.mxu1 %v2124_v44 }
 0x10d   :  { %1948 = vmatmul.mubr.msk.f32.gmra.mrb[2].mxu1 %vm213_vm1, %v316_v51  ;;  %v916_v51 = vld [vmem:[#allocation2 + $0x60] sm:$0xff] }
 0x10e   :  { %2127 = vmatpush3.bf16.msra.mxu1 %v2124_v44  ;;  %1958 = vmatprep.mubr.msk.f32.mxu1 %vm213_vm1, %v443_v52  ;;  %v917_v52 = vld [vmem:[#allocation2 + $0x68] sm:$0xff] }
 0x10f   :  { %2161 = vmatprep.subr.bf16.mxu1 %v2160_v28 }
 0x111   :  { %1959 = vmatmul.mubr.msk.f32.vlgmr.msra.gmra.mrb[0].mxu1 %vm213_vm1, %v439_v54 }
 0x112   :  { %1961 = vmatprep.mubr.msk.f32.mxu1 %vm213_vm1, %v445_v55  ;;  %2163 = vmatpush3.bf16.msra.mxu1 %v2160_v28  ;;  %v2152_v55 = vpack.c.bf16 %v917_v52, %v916_v51 }
 0x115   :  { %1962 = vmatmul.mubr.msk.f32.gmra.mrb[2].mxu1 %vm213_vm1, %v437_v56 }
 0x1e4   :  { %v1960_v2 = vpop.f32.mrb[0].mxu1 }
 0x1e5   :  { %v2208_v3 = vadd.f32 %v1960_v2, %v1744_v1  ;;  %v529_v4 = vpop.f32.mrb[1].mxu1 }
 0x1e6   :  { %v2209_v5 = vadd.f32 %v1744_v1, %v529_v4 }
 0x1e7   :  { %v553_v8 = vmax.f32 %v2208_v3, 0.0 }
 0x1e8   :  { %v552_v6 = vmax.f32 %v2209_v5, 0.0  ;;  %v1963_v7 = vpop.f32.mrb[2].mxu1 }
 0x1e9   :  { %v2210_v9 = vadd.f32 %v1963_v7, %v1744_v1  ;;  %v539_v10 = vpop.f32.mrb[3].mxu1 }
 0x1ea   :  { %v2211_v11 = vadd.f32 %v1744_v1, %v539_v10  ;;  %1972 = vmatprep.mubr.msk.f32.mxu0 %vm213_vm1, %v552_v6 }
 0x1eb   :  { %1973 = vmatmul.mubr.msk.f32.vlgmr.msra.gmra.mrb[4].mxu0 %vm213_vm1, %v553_v8  ;;  %v555_v13 = vmax.f32 %v2210_v9, 0.0 }
 0x1ec   :  { %v554_v12 = vmax.f32 %v2211_v11, 0.0  ;;  %2139 = vmatpush3.bf16.msra.mxu0 %v2136_v16  ;;  %v1763_v16 = vld [vmem:[%s2716_s5 + $0x1] ss:$0 sm:$0xff] }
 0x1ed   :  { %2141 = vmatprep.subr.bf16.mxu0 %v2140_v19 }
 0x1ee   :  { %1975 = vmatprep.mubr.msk.f32.mxu0 %vm213_vm1, %v554_v12 }
 0x1ef   :  { %1976 = vmatmul.mubr.msk.f32.gmra.mrb[6].mxu0 %vm213_vm1, %v555_v13  ;;  %v1028_v13 = vld [vmem:[#allocation5 + $0x30] sm:$0xff] }
 0x1f0   :  { %2143 = vmatpush3.bf16.msra.mxu0 %v2140_v19  ;;  %v2164_v15 = vpack.c.bf16 %v1029_v14, %v1028_v13 }
 0x1f1   :  { %2145 = vmatprep.subr.bf16.mxu0 %v2144_v22 }
 0x1f2   :  { %2165 = vmatprep.subr.bf16.mxu1 %v2164_v15 }
 0x1f3   :  { %2167 = vmatpush3.bf16.msra.mxu1 %v2164_v15 }
 0x2be   :  { %v1974_v33 = vpop.f32.mrb[4].mxu0 }
 0x2bf   :  { %v651_v34 = vadd.f32 %v1974_v33, %v1757_v29  ;;  %v645_v35 = vpop.f32.mrb[5].mxu0 }
 0x2c0   :  { %v646_v36 = vadd.f32 %v1757_v29, %v645_v35  ;;  %v1144_v35 = vld [vmem:[#allocation2 + $0x100] sm:$0xff] }
 0x2c1   :  { %v665_v38 = vadd.f32 %v651_v34, %v2441_v24 }
 0x2c2   :  { %v664_v39 = vadd.f32 %v646_v36, %v2439_v23  ;;  %v1977_v40 = vpop.f32.mrb[6].mxu0  ;;  %v2539_v23 = vpop.permute.xlu1 %85  ;;  %v1145_v36 = vld [vmem:[#allocation2 + $0x108] sm:$0xff] }
 0x2c3   :  { %v661_v43 = vadd.f32 %v1977_v40, %v1757_v29  ;;  %v655_v44 = vpop.f32.mrb[7].mxu0  ;;  %v2535_v48 = vmul.f32 %v665_v38, %v2532_v46  ;;  %v2168_v38 = vpack.c.bf16 %v1145_v36, %v1144_v35  ;;  %v1147_v40 = vld [vmem:[#allocation2 + $0x118] sm:$0xff] }
 0x2c4   :  { %v2530_v45 = vmul.f32 %v664_v39, %v2523_v31  ;;  %v656_v47 = vadd.f32 %v1757_v29, %v655_v44  ;;  %v1146_v39 = vld [vmem:[#allocation2 + $0x110] sm:$0xff] }
 0x2c5   :  { %v667_v49 = vadd.f32 %v661_v43, %v2447_v30  ;;  %v783_v56 = vrot.slane %v2535_v48, 6  ;;  %v901_v6 = vrot.slane %v2535_v48, 4  ;;  %2169 = vmatprep.subr.bf16.mxu1 %v2168_v38  ;;  %v2172_v41 = vpack.c.bf16 %v1147_v40, %v1146_v39  ;;  %v1267_v43 = vld [vmem:[#allocation2 + $0xe8] sm:$0xff] }
 0x2c6   :  { %v666_v24 = vadd.f32 %v656_v47, %v2451_v32  ;;  %1986 = vmatprep.mubr.msk.f32.mxu0 %vm213_vm1, %v2530_v45  ;;  %v782_v30 = vrot.slane %v2530_v45, 6  ;;  %v900_v2 = vrot.slane %v2530_v45, 4  ;;  %v2176_v44 = vpack.c.bf16 %v1267_v43, %v1266_v42  ;;  %v1488_v47 = vld [vmem:[#allocation5 + $0x40] sm:$0xff]  ;;  %v1606_v42 = vld [vmem:[%s2719_s8 + $0x8] sm:$0xff] }
 0x2c7   :  { %v2544_v53 = vmul.f32 %v667_v49, %v2539_v23  ;;  %1987 = vmatmul.mubr.msk.f32.vlgmr.msra.gmra.mrb[8].mxu0 %vm213_vm1, %v2535_v48  ;;  %v1489_v49 = vld [vmem:[#allocation5 + $0x48] sm:$0xff] }
 0x2c8   :  { %v2549_v54 = vmul.f32 %v666_v24, %v2525_v37  ;;  %2147 = vmatpush3.bf16.msra.mxu0 %v2144_v22  ;;  %v788_v1 = vsel %vm436_vm4, %v782_v30, %v783_v56  ;;  %v907_v10 = vsel %vm904_vm6, %v900_v2, %v901_v6  ;;  %v1777_v24 = vld [vmem:[%s2718_s7 + $0x1] ss:$0 sm:$0xff] }
 0x2c9   :  { %2149 = vmatprep.subr.bf16.mxu0 %v2148_v50  ;;  %v785_v32 = vrot.slane %v2544_v53, 6  ;;  %v903_v63 = vrot.slane %v2544_v53, 4 }
 0x2ca   :  { %1989 = vmatprep.mubr.msk.f32.mxu0 %vm213_vm1, %v2549_v54  ;;  %v784_v57 = vrot.slane %v2549_v54, 6  ;;  %v902_v5 = vrot.slane %v2549_v54, 4 }
 0x2cb   :  { %1990 = vmatmul.mubr.msk.f32.gmra.mrb[10].mxu0 %vm213_vm1, %v2544_v53  ;;  %v789_v60 = vsel %vm436_vm4, %v785_v32, %v782_v30  ;;  %v908_v4 = vsel %vm904_vm6, %v903_v63, %v900_v2  ;;  %v2180_v2 = vpack.c.bf16 %v1269_v59, %v1268_v58 }
 0x2cc   :  { %2151 = vmatpush3.bf16.msra.mxu0 %v2148_v50  ;;  %v790_v61 = vsel %vm441_vm5, %v789_v60, 0.0  ;;  %v787_v62 = vsel %vm436_vm4, %v783_v56, %v784_v57  ;;  %v786_v7 = vsel %vm436_vm4, %v784_v57, %v785_v32  ;;  %v911_v8 = vsel %vm909_vm7, %v908_v4, 0.0 }
 0x2cd   :  { %2000 = vmatprep.mubr.msk.f32.mxu0 %vm213_vm1, %v790_v61  ;;  %2153 = vmatprep.subr.bf16.mxu0 %v2152_v55  ;;  %v792_v3 = vsel %vm441_vm5, %v787_v62, 0.0  ;;  %v906_v9 = vsel %vm904_vm6, %v901_v6, %v902_v5  ;;  %v905_v12 = vsel %vm904_vm6, %v902_v5, %v903_v63  ;;  %v2192_v50 = vpack.c.bf16 %v1489_v49, %v1488_v47  ;;  %v1608_v47 = vld [vmem:[%s2719_s8 + $0x18] sm:$0xff] }
 0x2ce   :  { %v913_v11 = vsel %vm909_vm7, %v906_v9, 0.0  ;;  %v1380_v9 = vld [vmem:[#allocation2 + $0xd0] sm:$0xff] }
 0x2cf   :  { %2001 = vmatmul.mubr.msk.f32.vlgmr.msra.gmra.mrb[8].mxu0 %vm213_vm1, %v788_v1 }
 0x2d0   :  { %2155 = vmatpush3.bf16.msra.mxu0 %v2152_v55  ;;  %2003 = vmatprep.mubr.msk.f32.mxu0 %vm213_vm1, %v792_v3 }
 0x2d1   :  { %2157 = vmatprep.subr.bf16.mxu0 %v2156_v0 }
 0x2d3   :  { %2004 = vmatmul.mubr.msk.f32.gmra.mrb[10].mxu0 %vm213_vm1, %v786_v7 }
 0x2d4   :  { %2159 = vmatpush3.bf16.msra.mxu0 %v2156_v0  ;;  %2014 = vmatprep.mubr.msk.f32.mxu0 %vm213_vm1, %v911_v8 }
 0x2d5   :  { %2193 = vmatprep.subr.bf16.mxu0 %v2192_v50 }
 0x2d7   :  { %2015 = vmatmul.mubr.msk.f32.vlgmr.msra.gmra.mrb[8].mxu0 %vm213_vm1, %v907_v10  ;;  %v1381_v10 = vld [vmem:[#allocation2 + $0xd8] sm:$0xff] }
 0x2d8   :  { %2017 = vmatprep.mubr.msk.f32.mxu0 %vm213_vm1, %v913_v11  ;;  %2195 = vmatpush3.bf16.msra.mxu0 %v2192_v50  ;;  %v2188_v14 = vpack.c.bf16 %v1381_v10, %v1380_v9  ;;  %v1795_v50 = vld [vmem:[%s2718_s7 + $0x2] ss:$0 sm:$0xff] }
 0x2db   :  { %2018 = vmatmul.mubr.msk.f32.gmra.mrb[10].mxu0 %vm213_vm1, %v905_v12 }
 0x3aa   :  { %v2016_v17 = vpop.f32.mrb[8].mxu0 }
 0x3ab   :  { %v2212_v18 = vadd.f32 %v2016_v17, %v1763_v16  ;;  %v998_v19 = vpop.f32.mrb[9].mxu0 }
 0x3ac   :  { %v2213_v20 = vadd.f32 %v1763_v16, %v998_v19  ;;  %v1490_v19 = vld [vmem:[#allocation5 + $0x50] sm:$0xff] }
 0x3ad   :  { %v1022_v25 = vmax.f32 %v2212_v18, 0.0  ;;  %v2330_v18 = vmov 0.0  }
 0x3ae   :  { %v1021_v21 = vmax.f32 %v2213_v20, 0.0  ;;  %v2019_v22 = vpop.f32.mrb[10].mxu0  ;;  %v1491_v20 = vld [vmem:[#allocation5 + $0x58] sm:$0xff] }
 0x3af   :  { %v2214_v26 = vadd.f32 %v2019_v22, %v1763_v16  ;;  %v1008_v28 = vpop.f32.mrb[11].mxu0 }
 0x3b0   :  { %v2215_v29 = vadd.f32 %v1763_v16, %v1008_v28  ;;  %2028 = vmatprep.mubr.msk.f32.mxu1 %vm213_vm1, %v1021_v21  ;;  %v2196_v21 = vpack.c.bf16 %v1491_v20, %v1490_v19 }
 0x3b1   :  { %2029 = vmatmul.mubr.msk.f32.vlgmr.msra.gmra.mrb[4].mxu1 %vm213_vm1, %v1022_v25  ;;  %v1024_v34 = vmax.f32 %v2214_v26, 0.0 }
 0x3b2   :  { %v1023_v33 = vmax.f32 %v2215_v29, 0.0  ;;  %2171 = vmatpush3.bf16.msra.mxu1 %v2168_v38  ;;  %2197 = vmatprep.subr.bf16.mxu0 %v2196_v21 }
 0x3b3   :  { %2173 = vmatprep.subr.bf16.mxu1 %v2172_v41  ;;  %2199 = vmatpush3.bf16.msra.mxu0 %v2196_v21 }
 0x3b4   :  { %2031 = vmatprep.mubr.msk.f32.mxu1 %vm213_vm1, %v1023_v33 }
 0x3b5   :  { %2032 = vmatmul.mubr.msk.f32.gmra.mrb[6].mxu1 %vm213_vm1, %v1024_v34 }
 0x3b6   :  { %2175 = vmatpush3.bf16.msra.mxu1 %v2172_v41  ;;  %v1605_v41 = vld [vmem:[%s2719_s8] sm:$0xff] }
 0x3b7   :  { %2177 = vmatprep.subr.bf16.mxu1 %v2176_v44  ;;  %v2200_v43 = vpack.c.bf16 %v1606_v42, %v1605_v41 }
 0x3b9   :  { %2201 = vmatprep.subr.bf16.mxu0 %v2200_v43 }
 0x484   :  { %v2030_v51 = vpop.f32.mrb[4].mxu1 }
 0x485   :  { %v1122_v52 = vadd.f32 %v2030_v51, %v1777_v24  ;;  %v1116_v30 = vpop.f32.mrb[5].mxu1 }
 0x486   :  { %v1117_v32 = vadd.f32 %v1777_v24, %v1116_v30 }
 0x487   :  { %v1136_v55 = vadd.f32 %v1122_v52, %v2535_v48  ;;  %v1379_v48 = vld [vmem:[#allocation2 + $0xc8] sm:$0xff] }
 0x488   :  { %v1135_v56 = vadd.f32 %v1117_v32, %v2530_v45  ;;  %v2033_v57 = vpop.f32.mrb[6].mxu1  ;;  %v1378_v45 = vld [vmem:[#allocation2 + $0xc0] sm:$0xff] }
 0x489   :  { %v1132_v60 = vadd.f32 %v2033_v57, %v1777_v24  ;;  %v1126_v61 = vpop.f32.mrb[7].mxu1  ;;  %v2613_v0 = vmul.f32 %v1136_v55, %v2532_v46  ;;  %v2184_v6 = vpack.c.bf16 %v1379_v48, %v1378_v45 }
 0x48a   :  { %v2610_v62 = vmul.f32 %v1135_v56, %v2523_v31  ;;  %v1127_v63 = vadd.f32 %v1777_v24, %v1126_v61 }
 0x48b   :  { %v1138_v1 = vadd.f32 %v1132_v60, %v2544_v53  ;;  %v1254_v7 = vrot.slane %v2613_v0, 4 }
 0x48c   :  { %v1137_v3 = vadd.f32 %v1127_v63, %v2549_v54  ;;  %2042 = vmatprep.mubr.msk.f32.mxu1 %vm213_vm1, %v2610_v62  ;;  %v1253_v53 = vrot.slane %v2610_v62, 4 }
 0x48d   :  { %v2620_v4 = vmul.f32 %v1138_v1, %v2539_v23  ;;  %2043 = vmatmul.mubr.msk.f32.vlgmr.msra.gmra.mrb[8].mxu1 %vm213_vm1, %v2613_v0 }
 0x48e   :  { %v2625_v5 = vmul.f32 %v1137_v3, %v2525_v37  ;;  %2179 = vmatpush3.bf16.msra.mxu1 %v2176_v44  ;;  %v1259_v15 = vsel %vm904_vm6, %v1253_v53, %v1254_v7  ;;  %v1607_v44 = vld [vmem:[%s2719_s8 + $0x10] sm:$0xff] }
 0x48f   :  { %2181 = vmatprep.subr.bf16.mxu1 %v2180_v2  ;;  %v1256_v54 = vrot.slane %v2620_v4, 4  ;;  %v2204_v49 = vpack.c.bf16 %v1608_v47, %v1607_v44 }
 0x490   :  { %2045 = vmatprep.mubr.msk.f32.mxu1 %vm213_vm1, %v2625_v5  ;;  %v1255_v8 = vrot.slane %v2625_v5, 4 }
 0x491   :  { %2046 = vmatmul.mubr.msk.f32.gmra.mrb[10].mxu1 %vm213_vm1, %v2620_v4  ;;  %v1260_v11 = vsel %vm904_vm6, %v1256_v54, %v1253_v53 }
 0x492   :  { %2183 = vmatpush3.bf16.msra.mxu1 %v2180_v2  ;;  %v1261_v12 = vsel %vm909_vm7, %v1260_v11, 0.0  ;;  %v1258_v13 = vsel %vm904_vm6, %v1254_v7, %v1255_v8  ;;  %v1257_v17 = vsel %vm904_vm6, %v1255_v8, %v1256_v54  ;;  %v1800_v2 = vld [vmem:[%s2720_s9] ss:$0 sm:$0xff]  ;;  %s2297_s9 = scalar_lea.vmem %s1727_s12, 512 }
 0x493   :  { %2056 = vmatprep.mubr.msk.f32.mxu1 %vm213_vm1, %v1261_v12  ;;  %2185 = vmatprep.subr.bf16.mxu1 %v2184_v6  ;;  %v1263_v16 = vsel %vm909_vm7, %v1258_v13, 0.0  ;;  %p2298_p2 = scmp.ne.s32.totalorder %s1727_s12, %s2297_s9  ;;  %p2303_p4 = scmp.lt.s32.totalorder %s2297_s9, %s2297_s9 }
 0x495   :  { %2057 = vmatmul.mubr.msk.f32.vlgmr.msra.gmra.mrb[8].mxu1 %vm213_vm1, %v1259_v15  ;;  %p2304_p5 = por %p2303_p4, %p2302_p3 }
 0x496   :  { %2187 = vmatpush3.bf16.msra.mxu1 %v2184_v6  ;;  %2059 = vmatprep.mubr.msk.f32.mxu1 %vm213_vm1, %v1263_v16 }
 0x497   :  { %2189 = vmatprep.subr.bf16.mxu1 %v2188_v14  ;;  %p2305_p6 = pnand %p2304_p5, %p2298_p2 }
 0x499   :  { %2060 = vmatmul.mubr.msk.f32.gmra.mrb[10].mxu1 %vm213_vm1, %v1257_v17 }
 0x49a   :  { %2191 = vmatpush3.bf16.msra.mxu1 %v2188_v14  ;;  %2070 = vmatprep.mubr.f32.mxu1 %v2330_v18 }
 0x49d   :  { %2071 = vmatmul.mubr.msk.f32.vlgmr.msra.gmra.mrb[8].mxu1 %vm213_vm1, %v2610_v62 }
 0x49e   :  { %2073 = vmatprep.mubr.f32.mxu1 %v2330_v18 }
 0x4a1   :  { %2074 = vmatmul.mubr.msk.f32.gmra.mrb[10].mxu1 %vm213_vm1, %v2625_v5 }
 0x570   :  { %v2072_v22 = vpop.f32.mrb[8].mxu1 }
 0x571   :  { %v2216_v25 = vadd.f32 %v2072_v22, %v1783_v27  ;;  %v1460_v26 = vpop.f32.mrb[9].mxu1 }
 0x572   :  { %v2217_v28 = vadd.f32 %v1783_v27, %v1460_v26 }
 0x573   :  { %v1484_v34 = vmax.f32 %v2216_v25, 0.0 }
 0x574   :  { %v1483_v29 = vmax.f32 %v2217_v28, 0.0  ;;  %v2075_v33 = vpop.f32.mrb[10].mxu1 }
 0x575   :  { %v2218_v35 = vadd.f32 %v2075_v33, %v1783_v27  ;;  %v1470_v36 = vpop.f32.mrb[11].mxu1 }
 0x576   :  { %v2219_v38 = vadd.f32 %v1783_v27, %v1470_v36  ;;  %2084 = vmatprep.mubr.msk.f32.mxu0 %vm213_vm1, %v1483_v29 }
 0x577   :  { %2085 = vmatmul.mubr.msk.f32.vlgmr.msra.gmra.mrb[12].mxu0 %vm213_vm1, %v1484_v34  ;;  %v1486_v40 = vmax.f32 %v2218_v35, 0.0 }
 0x578   :  { %v1485_v39 = vmax.f32 %v2219_v38, 0.0  ;;  %2203 = vmatpush3.bf16.msra.mxu0 %v2200_v43 }
 0x579   :  { %2205 = vmatprep.subr.bf16.mxu0 %v2204_v49 }
 0x57a   :  { %2087 = vmatprep.mubr.msk.f32.mxu0 %vm213_vm1, %v1485_v39 }
 0x57b   :  { %2088 = vmatmul.mubr.msk.f32.gmra.mrb[14].mxu0 %vm213_vm1, %v1486_v40 }
 0x57c   :  { %2207 = vmatpush3.bf16.msra.mxu0 %v2204_v49 }
 0x64a   :  { %v2086_v24 = vpop.f32.mrb[12].mxu0 }
 0x64b   :  { %v1584_v51 = vadd.f32 %v2086_v24, %v1795_v50  ;;  %v1578_v52 = vpop.f32.mrb[13].mxu0 }
 0x64c   :  { %v1579_v30 = vadd.f32 %v1795_v50, %v1578_v52 }
 0x64d   :  { %v1598_v32 = vadd.f32 %v1584_v51, %v2613_v0 }
 0x64e   :  { %v1597_v55 = vadd.f32 %v1579_v30, %v2610_v62  ;;  %v2089_v56 = vpop.f32.mrb[14].mxu0 }
 0x64f   :  { %v1594_v57 = vadd.f32 %v2089_v56, %v1795_v50  ;;  %v1588_v58 = vpop.f32.mrb[15].mxu0  ;;  %v1602_v61 = vmul.f32 %v1598_v32, %v2532_v46 }
 0x650   :  { %v1601_v59 = vmul.f32 %v1597_v55, %v2523_v31  ;;  %v1589_v60 = vadd.f32 %v1795_v50, %v1588_v58 }
 0x651   :  { %v1600_v63 = vadd.f32 %v1594_v57, %v2620_v4 }
 0x652   :  { %v1599_v1 = vadd.f32 %v1589_v60, %v2625_v5  ;;  %2098 = vmatprep.mubr.msk.f32.mxu0 %vm213_vm1, %v1601_v59 }
 0x653   :  { %2099 = vmatmul.mubr.msk.f32.vlgmr.msra.gmra.mrb[16].mxu0 %vm213_vm1, %v1602_v61  ;;  %v1604_v62 = vmul.f32 %v1600_v63, %v2539_v23 }
 0x654   :  { %v1603_v0 = vmul.f32 %v1599_v1, %v2525_v37 }
 0x656   :  { %2101 = vmatprep.mubr.msk.f32.mxu0 %vm213_vm1, %v1603_v0 }
 0x657   :  { %2102 = vmatmul.mubr.msk.f32.gmra.mrb[18].mxu0 %vm213_vm1, %v1604_v62 }
 0x726   :  { %v2100_v3 = vpop.f32.mrb[16].mxu0 }
 0x727   :  { %v1700_v45 = vadd.f32 %v2100_v3, %v1800_v2  ;;  %v1694_v48 = vpop.f32.mrb[17].mxu0 }
 0x728   :  { %v1695_v4 = vadd.f32 %v1800_v2, %v1694_v48 }
 0x729   :  { %v1714_v5 = vmul.f32 %v1700_v45, %v2532_v46 }
 0x72a   :  { %v1713_v53 = vmul.f32 %v1695_v4, %v2523_v31  ;;  %v2103_v54 = vpop.f32.mrb[18].mxu0 }
 0x72b   :  { %1718 = vst [vmem:[#allocation7 + $0x8] sm:$0xff] %v1714_v5  ;;  %v1710_v6 = vadd.f32 %v2103_v54, %v1800_v2  ;;  %v1704_v7 = vpop.f32.mrb[19].mxu0 }
 0x72c   :  { %1717 = vst [vmem:[#allocation7] sm:$0xff] %v1713_v53  ;;  %v1705_v8 = vadd.f32 %v1800_v2, %v1704_v7 }
 0x72d   :  { %v1716_v9 = vmul.f32 %v1710_v6, %v2539_v23 }
 0x72e   :  { %v1715_v10 = vmul.f32 %v1705_v8, %v2525_v37 }
 0x72f   :  { %1720 = vst [vmem:[#allocation7 + $0x18] sm:$0xff] %v1716_v9 }
 0x730   :  { %1719 = vst [vmem:[#allocation7 + $0x10] sm:$0xff] %v1715_v10 }
 0x731   :  { %2308 = shalt.err (!%p2305_p6)
}
 0x732   :  { %s2309_s16 = scalar_lea.hbm %s2721_s10, 512 }
 0x733   :  { %p2310_p7 = scmp.ne.s32.totalorder %s2721_s10, %s2309_s16  ;;  %p2313_p8 = scmp.lt.u32.totalorder %s2309_s16, %s2721_s10 }
 0x735   :  { %p2315_p9 = pnand %p2313_p8, %p2310_p7 }
 0x737   :  { %2318 = shalt.err (!%p2315_p9)
}
 0x738   :  { %1732 = dma.vmem_to_hbm [thread:$0]  %s1727_s12, 512, %s2721_s10, [#allocation4], %s2326_s23, %s2326_s23, %s2327_s24  }
 0x739   :  { %2323 = dma.done.wait [#allocation4], 512  }
 0x73a   :  { %2324 = vsyncadd [#allocation4], 4294966784 }
 0x73b   :  { %1736 = vsyncpa [#allocation3], 1 }
 0x73c   :  { %1737 = vsyncpa [#allocation6], 1 }
 0x73d   :  { %1738 = vsyncpa [#allocation4], 1 }

</bundles_post_ra>
